<compile_context>
chip_gen: v7x
topology: tpu7x:2x2x1
jax: 0.10.0
libtpu: 0.0.40
codegen_flags: <defaults>
</compile_context>

<pallas_src>
import functools

import jax
import jax.numpy as jnp
from jax import lax
from jax.experimental import pallas as pl
from jax.experimental.pallas import tpu as pltpu

BN_EPS = 1e-5
LANE = 128


def _ru(x, m):
    return (x + m - 1) // m * m


# ---------------------------------------------------------------------------
# In-kernel helpers
# ---------------------------------------------------------------------------
def _emit_stats(s_ref, v, i, *, tm, m_vox, pack, cout, need_mask):
    """Write this tile's per-lane [sum; sumsq] partial into its own (8, CP)
    stats block (rows 2..7 zero so the store is a full, unmasked slab).
    Lanes are (voxel-slot j, channel c) = j*cout + c; the wrapper reduces over
    tiles and voxel slots."""

    def write(vv):
        s0 = jnp.sum(vv, axis=0, keepdims=True)
        s1 = jnp.sum(vv * vv, axis=0, keepdims=True)
        zpad = jnp.zeros((6, vv.shape[1]), jnp.float32)
        s_ref[...] = jnp.concatenate([s0, s1, zpad], axis=0)

    if not need_mask:
        write(v)
    else:
        last = pl.num_programs(0) - 1

        @pl.when(i != last)
        def _():
            write(v)

        @pl.when(i == last)
        def _():
            row = lax.broadcasted_iota(jnp.int32, v.shape, 0)
            lane = lax.broadcasted_iota(jnp.int32, v.shape, 1)
            vox = (i * tm + row) * pack + lane // cout
            write(jnp.where(vox < m_vox, v, 0.0))


# ---------------------------------------------------------------------------
# Pallas kernels
# ---------------------------------------------------------------------------
def _conv1_kernel(p_ref, w_ref, z_ref, s_ref, *, tm, m_vox, pack, cout,
                  need_mask):
    """Stage 1: packed conv-as-matmul.  p_ref [tm, pack*K] bf16, w_ref is the
    block-diagonal [pack*K, CP] bf16 weight -> packed z (f32 accum), bf16 store.
    Also emit this tile's BN1 per-lane stats partial."""
    i = pl.program_id(0)
    z = jnp.dot(p_ref[...], w_ref[...], preferred_element_type=jnp.float32)
    z_ref[...] = z.astype(z_ref.dtype)
    _emit_stats(s_ref, z, i, tm=tm, m_vox=m_vox, pack=pack, cout=cout,
                need_mask=need_mask)


def _bn_relu_mm_kernel(z_ref, a_ref, c_ref, w_ref, o_ref, s_ref, *, tm, m_vox,
                       pack, cout, need_mask):
    """Stages 2/3: h = relu(z*a + c) (folded BN affine, f32), then the packed
    1x1x1 conv o = h @ W_blockdiag (bf16 in / f32 accum), bf16 store, plus the
    next BN's per-lane stats partial (taken on the f32 o)."""
    i = pl.program_id(0)
    h = jnp.maximum(z_ref[...].astype(jnp.float32) * a_ref[...] + c_ref[...],
                    0.0)
    o = jnp.dot(h.astype(jnp.bfloat16), w_ref[...],
                preferred_element_type=jnp.float32)
    o_ref[...] = o.astype(o_ref.dtype)
    _emit_stats(s_ref, o, i, tm=tm, m_vox=m_vox, pack=pack, cout=cout,
                need_mask=need_mask)


def _bn_relu_kernel(z_ref, a_ref, c_ref, o_ref):
    """Stage 4: final BN3 + ReLU (folded affine), packed bf16 output."""
    o_ref[...] = jnp.maximum(
        z_ref[...].astype(jnp.float32) * a_ref[...] + c_ref[...],
        0.0).astype(o_ref.dtype)


# ---------------------------------------------------------------------------
# Glue: im2col for the strided 3D conv (feature order matches PyTorch weights)
# ---------------------------------------------------------------------------
def _im2col_3d(x, k, s):
    B, C, D, H, W = x.shape
    Do = (D - k) // s + 1
    Ho = (H - k) // s + 1
    Wo = (W - k) // s + 1
    patches = []
    for kd in range(k):
        for kh in range(k):
            for kw in range(k):
                patches.append(
                    x[:, :, kd:kd + Do * s:s, kh:kh + Ho * s:s, kw:kw + Wo * s:s])
    # [B, C, k^3, Do, Ho, Wo] -> cols ordered (Cin, kd, kh, kw)
    p = jnp.stack(patches, axis=2).reshape(B, C * k * k * k, Do, Ho, Wo)
    # rows ordered (b, d', h', w')
    p = p.transpose(0, 2, 3, 4, 1).reshape(B * Do * Ho * Wo, C * k * k * k)
    return p, (Do, Ho, Wo)


def _fold_bn(stats_tiles, count, gamma, beta, *, pack, cout, cp):
    """Per-tile [sum; sumsq] partials -> folded per-channel affine (a, c),
    tiled to the packed 128-lane layout ([1, CP] each)."""
    st = stats_tiles.reshape(-1, 8, cp)
    lane_sum = jnp.sum(st[:, 0, :], axis=0)
    lane_sq = jnp.sum(st[:, 1, :], axis=0)
    ch_sum = lane_sum[:pack * cout].reshape(pack, cout).sum(axis=0)
    ch_sq = lane_sq[:pack * cout].reshape(pack, cout).sum(axis=0)
    mean = ch_sum / count
    var = jnp.maximum(ch_sq / count - mean * mean, 0.0)
    a = gamma * lax.rsqrt(var + BN_EPS)
    c = beta - mean * a
    a_l = jnp.pad(jnp.tile(a, pack), (0, cp - pack * cout)).reshape(1, cp)
    c_l = jnp.pad(jnp.tile(c, pack), (0, cp - pack * cout)).reshape(1, cp)
    return a_l, c_l


# ---------------------------------------------------------------------------
# Wrapper
# ---------------------------------------------------------------------------
@functools.partial(jax.jit, static_argnames=("kernel_size", "stride", "tm_vox"))
def mlpconv_forward(x, params, *, kernel_size, stride, tm_vox=8192):
    """x: [B, Cin, D, H, W] float32 (NCDHW).  Returns [B, Cout, D', H', W']."""
    B, Cin, D, H, W = x.shape
    k, s = kernel_size, stride
    w1, b1, g1, be1, w2, b2, g2, be2, w3, b3, g3, be3 = params
    del b1, b2, b3  # conv biases cancel exactly under training-mode BatchNorm
    Cout = w1.shape[0]
    K = Cin * k * k * k

    # Packing geometry: 'pack' voxels x Cout channels per 128-lane row.
    if LANE % Cout == 0:
        pack, CP = LANE // Cout, LANE
    else:
        pack, CP = 1, _ru(Cout, LANE)
    KP = pack * K

    # im2col in bf16 (halves the k^3-inflated patch stream).
    # TODO(synk): move this into the stage-1 kernel via manual slab DMA.
    patches, (Do, Ho, Wo) = _im2col_3d(x.astype(jnp.bfloat16), k, s)
    M = B * Do * Ho * Wo
    M8 = -(-M // pack)                              # packed rows

    tm = min(max(tm_vox // pack, 8), M8)            # packed rows per tile
    if tm < M8:
        tm = max(32, (tm // 32) * 32)               # sublane-tile aligned
    n_t = -(-M8 // tm)
    MP8 = n_t * tm
    m_pad_vox = MP8 * pack - M
    need_mask = m_pad_vox != 0
    if m_pad_vox:
        patches = jnp.pad(patches, ((0, m_pad_vox), (0, 0)))
    p2 = patches.reshape(MP8, KP)                   # row-grouped, packed LHS

    # Block-diagonal weights (pack copies of [K,Cout] / [Cout,Cout] blocks).
    def bdiag(wmat, rows_out):
        r, c = wmat.shape
        out = jnp.zeros((rows_out, CP), jnp.float32)
        for j in range(pack):
            out = out.at[j * r:(j + 1) * r, j * c:(j + 1) * c].set(wmat)
        return out.astype(jnp.bfloat16)

    w1bd = bdiag(w1.reshape(Cout, K).T, KP)         # [KP, CP]
    w2bd = bdiag(w2.reshape(Cout, Cout).T, CP)      # [CP, CP]
    w3bd = bdiag(w3.reshape(Cout, Cout).T, CP)

    def rows(width):
        return pl.BlockSpec((tm, width), lambda i: (i, 0))

    def whole(shape):
        return pl.BlockSpec(shape, lambda i: (0, 0))

    stats_spec = pl.BlockSpec((8, CP), lambda i: (i, 0))
    stats_shape = jax.ShapeDtypeStruct((n_t * 8, CP), jnp.float32)
    act_shape = jax.ShapeDtypeStruct((MP8, CP), jnp.bfloat16)

    cparams = pltpu.CompilerParams(
        dimension_semantics=("parallel",),          # per-tile stats partials ->
        vmem_limit_bytes=32 * 1024 * 1024)          # megacore-friendly on v7x

    kw = dict(tm=tm, m_vox=M, pack=pack, cout=Cout, need_mask=need_mask)
    fold = functools.partial(_fold_bn, pack=pack, cout=Cout, cp=CP)
    stats_bytes = n_t * 8 * CP * 4

    # ---- stage 1: conv1 (packed im2col matmul) + BN1 per-tile stats ---------
    z1, st1 = pl.pallas_call(
        functools.partial(_conv1_kernel, **kw),
        grid=(n_t,),
        in_specs=[rows(KP), whole((KP, CP))],
        out_specs=[rows(CP), stats_spec],
        out_shape=[act_shape, stats_shape],
        compiler_params=cparams,
        cost_estimate=pl.CostEstimate(
            flops=2 * MP8 * KP * CP, transcendentals=0,
            bytes_accessed=MP8 * KP * 2 + KP * CP * 2 + MP8 * CP * 2
            + stats_bytes),
    )(p2, w1bd)
    a1, c1 = fold(st1, M, g1, be1)

    # ---- stage 2: BN1+ReLU -> conv2 (packed 1x1x1) + BN2 per-tile stats ------
    z2, st2 = pl.pallas_call(
        functools.partial(_bn_relu_mm_kernel, **kw),
        grid=(n_t,),
        in_specs=[rows(CP), whole((1, CP)), whole((1, CP)), whole((CP, CP))],
        out_specs=[rows(CP), stats_spec],
        out_shape=[act_shape, stats_shape],
        compiler_params=cparams,
        cost_estimate=pl.CostEstimate(
            flops=2 * MP8 * CP * CP + 4 * MP8 * CP, transcendentals=0,
            bytes_accessed=2 * MP8 * CP * 2 + CP * CP * 2 + stats_bytes),
    )(z1, a1, c1, w2bd)
    a2, c2 = fold(st2, M, g2, be2)

    # ---- stage 3: BN2+ReLU -> conv3 (packed 1x1x1) + BN3 per-tile stats ------
    z3, st3 = pl.pallas_call(
        functools.partial(_bn_relu_mm_kernel, **kw),
        grid=(n_t,),
        in_specs=[rows(CP), whole((1, CP)), whole((1, CP)), whole((CP, CP))],
        out_specs=[rows(CP), stats_spec],
        out_shape=[act_shape, stats_shape],
        compiler_params=cparams,
        cost_estimate=pl.CostEstimate(
            flops=2 * MP8 * CP * CP + 4 * MP8 * CP, transcendentals=0,
            bytes_accessed=2 * MP8 * CP * 2 + CP * CP * 2 + stats_bytes),
    )(z2, a2, c2, w3bd)
    a3, c3 = fold(st3, M, g3, be3)

    # ---- stage 4: BN3 + ReLU (packed, bf16) ----------------------------------
    y = pl.pallas_call(
        _bn_relu_kernel,
        grid=(n_t,),
        in_specs=[rows(CP), whole((1, CP)), whole((1, CP))],
        out_specs=rows(CP),
        out_shape=act_shape,
        compiler_params=cparams,
        cost_estimate=pl.CostEstimate(
            flops=3 * MP8 * CP, transcendentals=0,
            bytes_accessed=2 * MP8 * CP * 2),
    )(z3, a3, c3)

    # Unpack [MP8, CP] -> [M, Cout] -> NCDHW (f32), matching PyTorch.
    y = y[:, :pack * Cout].reshape(MP8 * pack, Cout)[:M]
    y = y.reshape(B, Do, Ho, Wo, Cout).transpose(0, 4, 1, 2, 3)
    return y.astype(jnp.float32)


# ---------------------------------------------------------------------------
# Pure-JAX reference (float32, for verification)
# ---------------------------------------------------------------------------
def mlpconv_reference(x, params, *, kernel_size, stride):
    w1, b1, g1, be1, w2, b2, g2, be2, w3, b3, g3, be3 = params

    def conv3d(x, w, b, s):
        y = lax.conv_general_dilated(
            x, w, window_strides=(s, s, s), padding="VALID",
            dimension_numbers=("NCDHW", "OIDHW", "NCDHW"))
        return y + b.reshape(1, -1, 1, 1, 1)

    def bn_relu(x, gamma, beta):
        mean = jnp.mean(x, axis=(0, 2, 3, 4), keepdims=True)
        var = jnp.mean((x - mean) ** 2, axis=(0, 2, 3, 4), keepdims=True)
        y = (x - mean) * lax.rsqrt(var + BN_EPS)
        y = y * gamma.reshape(1, -1, 1, 1, 1) + beta.reshape(1, -1, 1, 1, 1)
        return jnp.maximum(y, 0.0)

    y = bn_relu(conv3d(x, w1, b1, stride), g1, be1)
    y = bn_relu(conv3d(y, w2, b2, 1), g2, be2)
    y = bn_relu(conv3d(y, w3, b3, 1), g3, be3)
    return y


# ---------------------------------------------------------------------------
# Deterministic parameter construction (synthetic, no checkpoint load)
# ---------------------------------------------------------------------------
def init_params(key, in_channels, out_channels, kernel_size):
    ks = jax.random.split(key, 12)
    k = kernel_size

    def conv_w(kk, shape, fan_in):
        bound = 1.0 / jnp.sqrt(fan_in)
        return jax.random.uniform(kk, shape, jnp.float32, -bound, bound)

    fan1 = in_channels * k * k * k
    w1 = conv_w(ks[0], (out_channels, in_channels, k, k, k), fan1)
    b1 = conv_w(ks[1], (out_channels,), fan1)
    fan2 = out_channels
    w2 = conv_w(ks[2], (out_channels, out_channels, 1, 1, 1), fan2)
    b2 = conv_w(ks[3], (out_channels,), fan2)
    w3 = conv_w(ks[4], (out_channels, out_channels, 1, 1, 1), fan2)
    b3 = conv_w(ks[5], (out_channels,), fan2)
    g1 = 1.0 + 0.1 * jax.random.normal(ks[6], (out_channels,), jnp.float32)
    be1 = 0.1 * jax.random.normal(ks[7], (out_channels,), jnp.float32)
    g2 = 1.0 + 0.1 * jax.random.normal(ks[8], (out_channels,), jnp.float32)
    be2 = 0.1 * jax.random.normal(ks[9], (out_channels,), jnp.float32)
    g3 = 1.0 + 0.1 * jax.random.normal(ks[10], (out_channels,), jnp.float32)
    be3 = 0.1 * jax.random.normal(ks[11], (out_channels,), jnp.float32)
    return (w1, b1, g1, be1, w2, b2, g2, be2, w3, b3, g3, be3)


if __name__ == "__main__":
    key = jax.random.PRNGKey(0)
    kx, kp = jax.random.split(key)

    B, Cin, D, H, W = 2, 4, 8, 8, 8
    Cout, ksize, stride = 16, 3, 1

    x = jax.random.normal(kx, (B, Cin, D, H, W), jnp.float32)
    params = init_params(kp, Cin, Cout, ksize)

    out = mlpconv_forward(x, params, kernel_size=ksize, stride=stride)
    out = jax.block_until_ready(out)

    ref = mlpconv_reference(x, params, kernel_size=ksize, stride=stride)
    ref = jax.block_until_ready(ref)

    assert out.shape == ref.shape == (B, Cout, 6, 6, 6), out.shape
    # bf16 patches/weights on the MXU plus bf16-stored intermediates vs. a pure
    # f32 reference: check at relaxed but bug-separating tolerances (structural
    # errors -- wrong BN stats, wrong channel packing, wrong conv -- show up as
    # O(0.3+) max-abs / O(0.3+) relative error; bf16 rounding chains stay well
    # under the bounds below).
    max_err = float(jnp.max(jnp.abs(out - ref)))
    rel_err = float(jnp.linalg.norm((out - ref).ravel())
                    / (jnp.linalg.norm(ref.ravel()) + 1e-12))
    assert max_err < 1e-1 and rel_err < 2.5e-2, (max_err, rel_err)

    print("KERNEL_OK")
</pallas_src>

<mosaic_0001>
module attributes {stable_mosaic.version = 11 : i64} {
  func.func @_conv1_kernel(%arg0: i32, %arg1: memref<54x864xbf16, #tpu.memory_space<vmem>>, %arg2: memref<864x128xbf16, #tpu.memory_space<vmem>>, %arg3: memref<54x128xbf16, #tpu.memory_space<vmem>>, %arg4: memref<8x128xf32, #tpu.memory_space<vmem>>) attributes {dimension_semantics = [#tpu.dimension_semantics<parallel>], iteration_bounds = array<i64: 1>, scalar_prefetch = 0 : i64, scratch_operands = 0 : i64, tpu.core_type = #tpu.core_type<tc>, window_params = [{transform_indices = @transform_0, window_bounds = array<i64: 54, 864>}, {pipeline_mode = #tpu.pipeline_mode<synchronous>, transform_indices = @transform_1, window_bounds = array<i64: 864, 128>}, {transform_indices = @transform_2, window_bounds = array<i64: 54, 128>}, {transform_indices = @transform_3, window_bounds = array<i64: 8, 128>}]} {
    %c0 = arith.constant 0 : index
    %c0_0 = arith.constant 0 : index
    %0 = vector.load %arg1[%c0, %c0_0] : memref<54x864xbf16, #tpu.memory_space<vmem>>, vector<54x864xbf16>
    %c0_1 = arith.constant 0 : index
    %c0_2 = arith.constant 0 : index
    %1 = vector.load %arg2[%c0_1, %c0_2] : memref<864x128xbf16, #tpu.memory_space<vmem>>, vector<864x128xbf16>
    %cst = arith.constant dense<0.000000e+00> : vector<54x128xf32>
    %2 = tpu.matmul %0, %1, %cst {dimension_numbers = #tpu.dot_dimension_numbers<[1], [0], [0], [1], [0, 0, 1, 1], [], []>} : vector<54x864xbf16>, vector<864x128xbf16>, vector<54x128xf32> -> vector<54x128xf32>
    %3 = arith.truncf %2 : vector<54x128xf32> to vector<54x128xbf16>
    %c0_3 = arith.constant 0 : index
    %c0_4 = arith.constant 0 : index
    %4 = vector.load %arg3[%c0_3, %c0_4] : memref<54x128xbf16, #tpu.memory_space<vmem>>, vector<54x128xbf16>
    tpu.vector_store %arg3[%c0_3, %c0_4], %3 {strides = array<i32>} : memref<54x128xbf16, #tpu.memory_space<vmem>>, vector<54x128xbf16>,
    %cst_5 = arith.constant dense<0.000000e+00> : vector<128xf32>
    %5 = vector.multi_reduction <add>, %2, %cst_5 [0] : vector<54x128xf32> to vector<128xf32>
    %6 = vector.shape_cast %5 : vector<128xf32> to vector<1x128xf32>
    %7 = arith.mulf %2, %2 : vector<54x128xf32>
    %cst_6 = arith.constant dense<0.000000e+00> : vector<128xf32>
    %8 = vector.multi_reduction <add>, %7, %cst_6 [0] : vector<54x128xf32> to vector<128xf32>
    %9 = vector.shape_cast %8 : vector<128xf32> to vector<1x128xf32>
    %cst_7 = arith.constant 0.000000e+00 : f32
    %10 = vector.broadcast %cst_7 : f32 to vector<6x128xf32>
    %11 = tpu.concatenate %6, %9, %10 in 0 : vector<1x128xf32>, vector<1x128xf32>, vector<6x128xf32> -> vector<8x128xf32>
    %c0_8 = arith.constant 0 : index
    %c0_9 = arith.constant 0 : index
    %12 = vector.load %arg4[%c0_8, %c0_9] : memref<8x128xf32, #tpu.memory_space<vmem>>, vector<8x128xf32>
    tpu.vector_store %arg4[%c0_8, %c0_9], %11 {strides = array<i32>} : memref<8x128xf32, #tpu.memory_space<vmem>>, vector<8x128xf32>,
    return
  }
  func.func @transform_0(%arg0: i32) -> (i32, i32) {
    %c0_i32 = arith.constant 0 : i32
    %c0_i32_0 = arith.constant 0 : i32
    return %arg0, %c0_i32 : i32, i32
  }
  func.func @transform_1(%arg0: i32) -> (i32, i32) {
    %c0_i32 = arith.constant 0 : i32
    %c0_i32_0 = arith.constant 0 : i32
    %c0_i32_1 = arith.constant 0 : i32
    return %c0_i32, %c0_i32_0 : i32, i32
  }
  func.func @transform_2(%arg0: i32) -> (i32, i32) {
    %c0_i32 = arith.constant 0 : i32
    %c0_i32_0 = arith.constant 0 : i32
    return %arg0, %c0_i32 : i32, i32
  }
  func.func @transform_3(%arg0: i32) -> (i32, i32) {
    %c0_i32 = arith.constant 0 : i32
    %c0_i32_0 = arith.constant 0 : i32
    return %arg0, %c0_i32 : i32, i32
  }
}

module attributes {stable_mosaic.version = 11 : i64} {
  func.func @_bn_relu_mm_kernel(%arg0: i32, %arg1: memref<54x128xbf16, #tpu.memory_space<vmem>>, %arg2: memref<1x128xf32, #tpu.memory_space<vmem>>, %arg3: memref<1x128xf32, #tpu.memory_space<vmem>>, %arg4: memref<128x128xbf16, #tpu.memory_space<vmem>>, %arg5: memref<54x128xbf16, #tpu.memory_space<vmem>>, %arg6: memref<8x128xf32, #tpu.memory_space<vmem>>) attributes {dimension_semantics = [#tpu.dimension_semantics<parallel>], iteration_bounds = array<i64: 1>, scalar_prefetch = 0 : i64, scratch_operands = 0 : i64, tpu.core_type = #tpu.core_type<tc>, window_params = [{transform_indices = @transform_0, window_bounds = array<i64: 54, 128>}, {pipeline_mode = #tpu.pipeline_mode<synchronous>, transform_indices = @transform_1, window_bounds = array<i64: 1, 128>}, {pipeline_mode = #tpu.pipeline_mode<synchronous>, transform_indices = @transform_2, window_bounds = array<i64: 1, 128>}, {pipeline_mode = #tpu.pipeline_mode<synchronous>, transform_indices = @transform_3, window_bounds = array<i64: 128, 128>}, {transform_indices = @transform_4, window_bounds = array<i64: 54, 128>}, {transform_indices = @transform_5, window_bounds = array<i64: 8, 128>}]} {
    %c0 = arith.constant 0 : index
    %c0_0 = arith.constant 0 : index
    %0 = vector.load %arg1[%c0, %c0_0] : memref<54x128xbf16, #tpu.memory_space<vmem>>, vector<54x128xbf16>
    %1 = arith.extf %0 : vector<54x128xbf16> to vector<54x128xf32>
    %c0_1 = arith.constant 0 : index
    %c0_2 = arith.constant 0 : index
    %2 = vector.load %arg2[%c0_1, %c0_2] : memref<1x128xf32, #tpu.memory_space<vmem>>, vector<1x128xf32>
    %3 = vector.broadcast %2 : vector<1x128xf32> to vector<54x128xf32>
    %4 = arith.mulf %1, %3 : vector<54x128xf32>
    %c0_3 = arith.constant 0 : index
    %c0_4 = arith.constant 0 : index
    %5 = vector.load %arg3[%c0_3, %c0_4] : memref<1x128xf32, #tpu.memory_space<vmem>>, vector<1x128xf32>
    %6 = vector.broadcast %5 : vector<1x128xf32> to vector<54x128xf32>
    %7 = arith.addf %4, %6 : vector<54x128xf32>
    %cst = arith.constant 0.000000e+00 : f32
    %8 = vector.broadcast %cst : f32 to vector<54x128xf32>
    %9 = arith.maximumf %7, %8 : vector<54x128xf32>
    %10 = arith.truncf %9 : vector<54x128xf32> to vector<54x128xbf16>
    %c0_5 = arith.constant 0 : index
    %c0_6 = arith.constant 0 : index
    %11 = vector.load %arg4[%c0_5, %c0_6] : memref<128x128xbf16, #tpu.memory_space<vmem>>, vector<128x128xbf16>
    %cst_7 = arith.constant dense<0.000000e+00> : vector<54x128xf32>
    %12 = tpu.matmul %10, %11, %cst_7 {dimension_numbers = #tpu.dot_dimension_numbers<[1], [0], [0], [1], [0, 0, 1, 1], [], []>} : vector<54x128xbf16>, vector<128x128xbf16>, vector<54x128xf32> -> vector<54x128xf32>
    %13 = arith.truncf %12 : vector<54x128xf32> to vector<54x128xbf16>
    %c0_8 = arith.constant 0 : index
    %c0_9 = arith.constant 0 : index
    %14 = vector.load %arg5[%c0_8, %c0_9] : memref<54x128xbf16, #tpu.memory_space<vmem>>, vector<54x128xbf16>
    tpu.vector_store %arg5[%c0_8, %c0_9], %13 {strides = array<i32>} : memref<54x128xbf16, #tpu.memory_space<vmem>>, vector<54x128xbf16>,
    %cst_10 = arith.constant dense<0.000000e+00> : vector<128xf32>
    %15 = vector.multi_reduction <add>, %12, %cst_10 [0] : vector<54x128xf32> to vector<128xf32>
    %16 = vector.shape_cast %15 : vector<128xf32> to vector<1x128xf32>
    %17 = arith.mulf %12, %12 : vector<54x128xf32>
    %cst_11 = arith.constant dense<0.000000e+00> : vector<128xf32>
    %18 = vector.multi_reduction <add>, %17, %cst_11 [0] : vector<54x128xf32> to vector<128xf32>
    %19 = vector.shape_cast %18 : vector<128xf32> to vector<1x128xf32>
    %cst_12 = arith.constant 0.000000e+00 : f32
    %20 = vector.broadcast %cst_12 : f32 to vector<6x128xf32>
    %21 = tpu.concatenate %16, %19, %20 in 0 : vector<1x128xf32>, vector<1x128xf32>, vector<6x128xf32> -> vector<8x128xf32>
    %c0_13 = arith.constant 0 : index
    %c0_14 = arith.constant 0 : index
    %22 = vector.load %arg6[%c0_13, %c0_14] : memref<8x128xf32, #tpu.memory_space<vmem>>, vector<8x128xf32>
    tpu.vector_store %arg6[%c0_13, %c0_14], %21 {strides = array<i32>} : memref<8x128xf32, #tpu.memory_space<vmem>>, vector<8x128xf32>,
    return
  }
  func.func @transform_0(%arg0: i32) -> (i32, i32) {
    %c0_i32 = arith.constant 0 : i32
    %c0_i32_0 = arith.constant 0 : i32
    return %arg0, %c0_i32 : i32, i32
  }
  func.func @transform_1(%arg0: i32) -> (i32, i32) {
    %c0_i32 = arith.constant 0 : i32
    %c0_i32_0 = arith.constant 0 : i32
    %c0_i32_1 = arith.constant 0 : i32
    return %c0_i32, %c0_i32_0 : i32, i32
  }
  func.func @transform_2(%arg0: i32) -> (i32, i32) {
    %c0_i32 = arith.constant 0 : i32
    %c0_i32_0 = arith.constant 0 : i32
    %c0_i32_1 = arith.constant 0 : i32
    return %c0_i32, %c0_i32_0 : i32, i32
  }
  func.func @transform_3(%arg0: i32) -> (i32, i32) {
    %c0_i32 = arith.constant 0 : i32
    %c0_i32_0 = arith.constant 0 : i32
    %c0_i32_1 = arith.constant 0 : i32
    return %c0_i32, %c0_i32_0 : i32, i32
  }
  func.func @transform_4(%arg0: i32) -> (i32, i32) {
    %c0_i32 = arith.constant 0 : i32
    %c0_i32_0 = arith.constant 0 : i32
    return %arg0, %c0_i32 : i32, i32
  }
  func.func @transform_5(%arg0: i32) -> (i32, i32) {
    %c0_i32 = arith.constant 0 : i32
    %c0_i32_0 = arith.constant 0 : i32
    return %arg0, %c0_i32 : i32, i32
  }
}

module attributes {stable_mosaic.version = 11 : i64} {
  func.func @_bn_relu_kernel(%arg0: i32, %arg1: memref<54x128xbf16, #tpu.memory_space<vmem>>, %arg2: memref<1x128xf32, #tpu.memory_space<vmem>>, %arg3: memref<1x128xf32, #tpu.memory_space<vmem>>, %arg4: memref<54x128xbf16, #tpu.memory_space<vmem>>) attributes {dimension_semantics = [#tpu.dimension_semantics<parallel>], iteration_bounds = array<i64: 1>, scalar_prefetch = 0 : i64, scratch_operands = 0 : i64, tpu.core_type = #tpu.core_type<tc>, window_params = [{transform_indices = @transform_0, window_bounds = array<i64: 54, 128>}, {pipeline_mode = #tpu.pipeline_mode<synchronous>, transform_indices = @transform_1, window_bounds = array<i64: 1, 128>}, {pipeline_mode = #tpu.pipeline_mode<synchronous>, transform_indices = @transform_2, window_bounds = array<i64: 1, 128>}, {transform_indices = @transform_3, window_bounds = array<i64: 54, 128>}]} {
    %c0 = arith.constant 0 : index
    %c0_0 = arith.constant 0 : index
    %0 = vector.load %arg1[%c0, %c0_0] : memref<54x128xbf16, #tpu.memory_space<vmem>>, vector<54x128xbf16>
    %1 = arith.extf %0 : vector<54x128xbf16> to vector<54x128xf32>
    %c0_1 = arith.constant 0 : index
    %c0_2 = arith.constant 0 : index
    %2 = vector.load %arg2[%c0_1, %c0_2] : memref<1x128xf32, #tpu.memory_space<vmem>>, vector<1x128xf32>
    %3 = vector.broadcast %2 : vector<1x128xf32> to vector<54x128xf32>
    %4 = arith.mulf %1, %3 : vector<54x128xf32>
    %c0_3 = arith.constant 0 : index
    %c0_4 = arith.constant 0 : index
    %5 = vector.load %arg3[%c0_3, %c0_4] : memref<1x128xf32, #tpu.memory_space<vmem>>, vector<1x128xf32>
    %6 = vector.broadcast %5 : vector<1x128xf32> to vector<54x128xf32>
    %7 = arith.addf %4, %6 : vector<54x128xf32>
    %cst = arith.constant 0.000000e+00 : f32
    %8 = vector.broadcast %cst : f32 to vector<54x128xf32>
    %9 = arith.maximumf %7, %8 : vector<54x128xf32>
    %10 = arith.truncf %9 : vector<54x128xf32> to vector<54x128xbf16>
    %c0_5 = arith.constant 0 : index
    %c0_6 = arith.constant 0 : index
    %11 = vector.load %arg4[%c0_5, %c0_6] : memref<54x128xbf16, #tpu.memory_space<vmem>>, vector<54x128xbf16>
    tpu.vector_store %arg4[%c0_5, %c0_6], %10 {strides = array<i32>} : memref<54x128xbf16, #tpu.memory_space<vmem>>, vector<54x128xbf16>,
    return
  }
  func.func @transform_0(%arg0: i32) -> (i32, i32) {
    %c0_i32 = arith.constant 0 : i32
    %c0_i32_0 = arith.constant 0 : i32
    return %arg0, %c0_i32 : i32, i32
  }
  func.func @transform_1(%arg0: i32) -> (i32, i32) {
    %c0_i32 = arith.constant 0 : i32
    %c0_i32_0 = arith.constant 0 : i32
    %c0_i32_1 = arith.constant 0 : i32
    return %c0_i32, %c0_i32_0 : i32, i32
  }
  func.func @transform_2(%arg0: i32) -> (i32, i32) {
    %c0_i32 = arith.constant 0 : i32
    %c0_i32_0 = arith.constant 0 : i32
    %c0_i32_1 = arith.constant 0 : i32
    return %c0_i32, %c0_i32_0 : i32, i32
  }
  func.func @transform_3(%arg0: i32) -> (i32, i32) {
    %c0_i32 = arith.constant 0 : i32
    %c0_i32_0 = arith.constant 0 : i32
    return %arg0, %c0_i32 : i32, i32
  }
}

</mosaic_0001>

<bundles_post_ra>
// kernel: tile.33
= control target key start
LH: loop header
LB: loop body
LE: loop exit
PB: predicated region body
PF: predicated region fallthrough
CT: control target
= control target key end

     0   :  { %s22_s0 = inlined_call_operand.vmem [shape: f32[16], index: 0, kind: input, shape index: {}]   ;;  %s23_s1 = inlined_call_operand.vmem [shape: f32[8,16], index: 1, kind: output, shape index: {}]  }
   0x1   :  { %v4_v0 = vld [vmem:[%s22_s0] ss:$0 sm:$0xff] }
   0x2   :  { %5 = vst [vmem:[%s23_s1] sm:$0xff] %v4_v0 }

// kernel: mlpconv_forward.4
= control target key start
LH: loop header
LB: loop body
LE: loop exit
PB: predicated region body
PF: predicated region fallthrough
CT: control target
= control target key end

     0   :  { %vm603_vm0 = vcmask 785408   ;;  %vm913_vm1 = vcmask 1045504   ;;  %vm942_vm2 = vcmask 1040384   ;;  %vm944_vm3 = vcmask 1041408   ;;  %s1595_s1 = inlined_call_operand.vmem [shape: bf16[864,128], index: 1, kind: input, shape index: {}]   ;;  %s1596_s0 = inlined_call_operand.vmem [shape: bf16[54,864], index: 0, kind: input, shape index: {}]   ;;  %s1597_s2 = inlined_call_operand.vmem [shape: bf16[54,128], index: 2, kind: output, shape index: {0}]   ;;  %s1598_s3 = inlined_call_operand.vmem [shape: f32[8,128], index: 3, kind: output, shape index: {1}]  }
   0x1   :  { %v1222_v0 = vld [vmem:[%s1595_s1 + $0x40] sm:$0xff]   ;;  %v1226_v4 = vld [vmem:[%s1595_s1 + $0x48] sm:$0xff]   ;;  %v1230_v8 = vld [vmem:[%s1595_s1 + $0x50] sm:$0xff]  }
   0x2   :  { %v1223_v1 = vld [vmem:[%s1595_s1 + $0xc0] sm:$0xff]   ;;  %1072 = vmatprep.subr.bf16.mxu0 %v1222_v0  ;;  %v1227_v5 = vld [vmem:[%s1595_s1 + $0xc8] sm:$0xff]   ;;  %v1231_v9 = vld [vmem:[%s1595_s1 + $0xd0] sm:$0xff]  }
   0x3   :  { %v1224_v2 = vld [vmem:[%s1595_s1] sm:$0xff]   ;;  %1112 = vmatprep.subr.bf16.mxu1 %v1223_v1  ;;  %v1228_v6 = vld [vmem:[%s1595_s1 + $0x8] sm:$0xff]   ;;  %v1232_v10 = vld [vmem:[%s1595_s1 + $0x10] sm:$0xff]  }
   0x4   :  { %v1225_v3 = vld [vmem:[%s1595_s1 + $0x80] sm:$0xff]   ;;  %1073 = vmatpush3.bf16.msra.mxu0 %v1224_v2  ;;  %v1229_v7 = vld [vmem:[%s1595_s1 + $0x88] sm:$0xff]   ;;  %v1233_v11 = vld [vmem:[%s1595_s1 + $0x90] sm:$0xff]  }
   0x5   :  { %1113 = vmatpush3.bf16.msra.mxu1 %v1225_v3  ;;  %1074 = vmatprep.subr.bf16.mxu0 %v1226_v4  ;;  %v1234_v12 = vld [vmem:[%s1595_s1 + $0x58] sm:$0xff]   ;;  %v1238_v16 = vld [vmem:[%s1595_s1 + $0x60] sm:$0xff]   ;;  %v1242_v20 = vld [vmem:[%s1595_s1 + $0x68] sm:$0xff]  }
   0x6   :  { %1114 = vmatprep.subr.bf16.mxu1 %v1227_v5  ;;  %v1235_v13 = vld [vmem:[%s1595_s1 + $0xd8] sm:$0xff]   ;;  %v1239_v17 = vld [vmem:[%s1595_s1 + $0xe0] sm:$0xff]   ;;  %v1243_v21 = vld [vmem:[%s1595_s1 + $0xe8] sm:$0xff]  }
   0x7   :  { %v1236_v14 = vld [vmem:[%s1595_s1 + $0x18] sm:$0xff]   ;;  %v1240_v18 = vld [vmem:[%s1595_s1 + $0x20] sm:$0xff]   ;;  %v1244_v22 = vld [vmem:[%s1595_s1 + $0x28] sm:$0xff]  }
   0x8   :  { %1075 = vmatpush3.bf16.msra.mxu0 %v1228_v6  ;;  %v1237_v15 = vld [vmem:[%s1595_s1 + $0x98] sm:$0xff]   ;;  %v1241_v19 = vld [vmem:[%s1595_s1 + $0xa0] sm:$0xff]   ;;  %v1245_v23 = vld [vmem:[%s1595_s1 + $0xa8] sm:$0xff]  }
   0x9   :  { %1115 = vmatpush3.bf16.msra.mxu1 %v1229_v7  ;;  %1076 = vmatprep.subr.bf16.mxu0 %v1230_v8  ;;  %v1246_v24 = vld [vmem:[%s1595_s1 + $0x70] sm:$0xff]   ;;  %v1250_v28 = vld [vmem:[%s1595_s1 + $0x78] sm:$0xff]   ;;  %v1256_v33 = vld [vmem:[%s1596_s0 + $0x4] ss:$28 sps:$4 sm:$0xff]  }
   0xa   :  { %1116 = vmatprep.subr.bf16.mxu1 %v1231_v9  ;;  %v1247_v25 = vld [vmem:[%s1595_s1 + $0xf0] sm:$0xff]   ;;  %v1251_v29 = vld [vmem:[%s1595_s1 + $0xf8] sm:$0xff]   ;;  %v1257_v34 = vld [vmem:[%s1596_s0 + $0x8] ss:$28 sps:$4 sm:$0xff]   ;;  %648 = vmatprep.mubr.bf16.mxu0 %v1256_v33 }
   0xb   :  { %v1248_v26 = vld [vmem:[%s1595_s1 + $0x30] sm:$0xff]   ;;  %v1252_v30 = vld [vmem:[%s1595_s1 + $0x38] sm:$0xff]   ;;  %v1259_v35 = vld [vmem:[%s1596_s0 + $0xc] ss:$28 sps:$4 sm:$0xff]  }
   0xc   :  { %1077 = vmatpush3.bf16.msra.mxu0 %v1232_v10  ;;  %v1249_v27 = vld [vmem:[%s1595_s1 + $0xb0] sm:$0xff]   ;;  %v1253_v31 = vld [vmem:[%s1595_s1 + $0xb8] sm:$0xff]   ;;  %v1260_v36 = vld [vmem:[%s1595_s1 + $0x140] sm:$0xff]   ;;  %712 = vmatprep.mubr.bf16.mxu1 %v1259_v35 }
   0xd   :  { %1117 = vmatpush3.bf16.msra.mxu1 %v1233_v11  ;;  %1078 = vmatprep.subr.bf16.mxu0 %v1234_v12  ;;  %v1254_v32 = vld [vmem:[%s1596_s0] ss:$28 sps:$4 sm:$0xff]   ;;  %v1262_v38 = vld [vmem:[%s1595_s1 + $0x148] sm:$0xff]   ;;  %v1268_v42 = vld [vmem:[%s1596_s0 + $0x38] ss:$28 sps:$4 sm:$0xff]  }
   0xe   :  { %1118 = vmatprep.subr.bf16.mxu1 %v1235_v13  ;;  %v1261_v37 = vld [vmem:[%s1595_s1 + $0x100] sm:$0xff]   ;;  %v1263_v39 = vld [vmem:[%s1595_s1 + $0x108] sm:$0xff]   ;;  %v1264_v40 = vld [vmem:[%s1596_s0 + $0x3c] ss:$28 sps:$4 sm:$0xff]  }
   0xf   :  { %v1266_v41 = vld [vmem:[%s1596_s0 + $0x44] ss:$28 sps:$4 sm:$0xff]   ;;  %v1270_v44 = vld [vmem:[%s1595_s1 + $0x150] sm:$0xff]   ;;  %v1272_v46 = vld [vmem:[%s1595_s1 + $0x158] sm:$0xff]  }
  0x10   :  { %1079 = vmatpush3.bf16.msra.mxu0 %v1236_v14  ;;  %v1269_v43 = vld [vmem:[%s1596_s0 + $0x40] ss:$28 sps:$4 sm:$0xff]   ;;  %v1271_v45 = vld [vmem:[%s1595_s1 + $0x110] sm:$0xff]   ;;  %v1282_v54 = vld [vmem:[%s1595_s1 + $0x188] sm:$0xff]  }
  0x11   :  { %1119 = vmatpush3.bf16.msra.mxu1 %v1237_v15  ;;  %1080 = vmatprep.subr.bf16.mxu0 %v1238_v16  ;;  %v1273_v47 = vld [vmem:[%s1595_s1 + $0x180] sm:$0xff]   ;;  %v1274_v48 = vld [vmem:[%s1595_s1 + $0x118] sm:$0xff]   ;;  %v1275_v49 = vld [vmem:[%s1596_s0 + $0x74] ss:$28 sps:$4 sm:$0xff]  }
  0x12   :  { %1120 = vmatprep.subr.bf16.mxu1 %v1239_v17  ;;  %v1277_v50 = vld [vmem:[%s1596_s0 + $0x7c] ss:$28 sps:$4 sm:$0xff]   ;;  %v1279_v51 = vld [vmem:[%s1596_s0 + $0x70] ss:$28 sps:$4 sm:$0xff]   ;;  %v1281_v53 = vld [vmem:[%s1595_s1 + $0x160] sm:$0xff]  }
  0x13   :  { %v1280_v52 = vld [vmem:[%s1596_s0 + $0x78] ss:$28 sps:$4 sm:$0xff]   ;;  %v1283_v55 = vld [vmem:[%s1595_s1 + $0x120] sm:$0xff]   ;;  %v1284_v56 = vld [vmem:[%s1595_s1 + $0x168] sm:$0xff]  }
  0x14   :  { %1081 = vmatpush3.bf16.msra.mxu0 %v1240_v18  ;;  %v1285_v57 = vld [vmem:[%s1595_s1 + $0x190] sm:$0xff]   ;;  %v1286_v58 = vld [vmem:[%s1595_s1 + $0x128] sm:$0xff]   ;;  %v1292_v2 = vld [vmem:[%s1595_s1 + $0x198] sm:$0xff]  }
  0x15   :  { %1121 = vmatpush3.bf16.msra.mxu1 %v1241_v19  ;;  %1082 = vmatprep.subr.bf16.mxu0 %v1242_v20  ;;  %v38_v59 = vld [vmem:[%s1596_s0 + $0xa8] sm:$0x77]  ;;  %v39_v60 = vld [vmem:[%s1596_s0 + $0xb0] sm:$0x77]  ;;  %v1294_v4 = vld [vmem:[%s1595_s1 + $0x178] sm:$0xff]  }
  0x16   :  { %1122 = vmatprep.subr.bf16.mxu1 %v1243_v21  ;;  %v977_v61 = vcombine.high %v38_v59, %v38_v59  ;;  %v979_v62 = vcombine.high %v39_v60, %v39_v60  ;;  %v976_v63 = vcombine.low %v38_v59, %v38_v59  ;;  %v1291_v0 = vld [vmem:[%s1595_s1 + $0x170] sm:$0xff]   ;;  %v978_v1 = vcombine.low %v39_v60, %v39_v60  ;;  %v1295_v5 = vld [vmem:[%s1595_s1 + $0x1a0] sm:$0xff]   ;;  %v1296_v6 = vld [vmem:[%s1595_s1 + $0x138] sm:$0xff]  }
  0x17   :  { %v1293_v3 = vld [vmem:[%s1595_s1 + $0x130] sm:$0xff]   ;;  %v1300_v8 = vld [vmem:[%s1595_s1 + $0x1a8] sm:$0xff]   ;;  %v1306_v15 = vld [vmem:[%s1596_s0 + $0x84] ss:$28 sps:$4 sm:$0xff]  }
  0x18   :  { %1083 = vmatpush3.bf16.msra.mxu0 %v1244_v22  ;;  %v1299_v7 = vld [vmem:[%s1596_s0 + $0x14] ss:$28 sps:$4 sm:$0xff]   ;;  %v1303_v11 = vld [vmem:[%s1596_s0 + $0x4c] ss:$28 sps:$4 sm:$0xff]   ;;  %v40_v17 = vld [vmem:[%s1596_s0 + $0xb8] sm:$0x77] }
  0x19   :  { %1123 = vmatpush3.bf16.msra.mxu1 %v1245_v23  ;;  %1084 = vmatprep.subr.bf16.mxu0 %v1246_v24  ;;  %v1301_v9 = vld [vmem:[%s1596_s0 + $0x18] ss:$28 sps:$4 sm:$0xff]   ;;  %v1297_v10 = vld [vmem:[%s1596_s0 + $0x10] ss:$28 sps:$4 sm:$0xff]   ;;  %v1309_v13 = vld [vmem:[%s1596_s0 + $0x88] ss:$28 sps:$4 sm:$0xff]   ;;  %v981_v19 = vcombine.high %v40_v17, %v40_v17  ;;  %v980_v20 = vcombine.low %v40_v17, %v40_v17 }
  0x1a   :  { %1124 = vmatprep.subr.bf16.mxu1 %v1247_v25  ;;  %v1302_v12 = vld [vmem:[%s1596_s0 + $0x50] ss:$28 sps:$4 sm:$0xff]   ;;  %v1305_v14 = vld [vmem:[%s1596_s0 + $0x48] ss:$28 sps:$4 sm:$0xff]   ;;  %v1308_v18 = vld [vmem:[%s1596_s0 + $0x80] ss:$28 sps:$4 sm:$0xff]  }
  0x1b   :  { %v1310_v16 = vld [vmem:[%s1596_s0 + $0xc0] ss:$0 sps:$4 sm:$0x77]  }
  0x1c   :  { %1085 = vmatpush3.bf16.msra.mxu0 %v1248_v26 }
  0x1d   :  { %1125 = vmatpush3.bf16.msra.mxu1 %v1249_v27  ;;  %1086 = vmatprep.subr.bf16.mxu0 %v1250_v28 }
  0x1e   :  { %1126 = vmatprep.subr.bf16.mxu1 %v1251_v29 }
  0x20   :  { %1087 = vmatpush3.bf16.msra.mxu0 %v1252_v30 }
  0x21   :  { %1127 = vmatpush3.bf16.msra.mxu1 %v1253_v31  ;;  %1152 = vmatprep.subr.bf16.mxu0 %v1260_v36 }
  0x22   :  { %1202 = vmatprep.subr.bf16.mxu1 %v1273_v47 }
  0x23   :  { %649 = vmatmul.mubr.bf16.vlgmr.msra.gmra.mrb[0].mxu0 %v1254_v32 }
  0x24   :  { %713 = vmatmul.mubr.bf16.vlgmr.msra.gmra.mrb[0].mxu1 %v1257_v34  ;;  %1153 = vmatpush3.bf16.msra.mxu0 %v1261_v37 }
  0x25   :  { %1154 = vmatprep.subr.bf16.mxu0 %v1262_v38  ;;  %656 = vmatprep.mubr.bf16.mxu0 %v1264_v40 }
  0x26   :  { %720 = vmatprep.mubr.bf16.mxu1 %v1266_v41  ;;  %1203 = vmatpush3.bf16.msra.mxu1 %v1273_v47 }
  0x27   :  { %1204 = vmatprep.subr.bf16.mxu1 %v1282_v54 }
  0x28   :  { %1155 = vmatpush3.bf16.msra.mxu0 %v1263_v39 }
  0x29   :  { %1156 = vmatprep.subr.bf16.mxu0 %v1270_v44 }
  0x2a   :  { %1205 = vmatpush3.bf16.msra.mxu1 %v1282_v54 }
  0x2b   :  { %657 = vmatmul.mubr.bf16.gmra.mrb[4].mxu0 %v1268_v42  ;;  %1206 = vmatprep.subr.bf16.mxu1 %v1285_v57 }
  0x2c   :  { %721 = vmatmul.mubr.bf16.gmra.mrb[4].mxu1 %v1269_v43  ;;  %1157 = vmatpush3.bf16.msra.mxu0 %v1271_v45 }
  0x2d   :  { %1158 = vmatprep.subr.bf16.mxu0 %v1272_v46  ;;  %664 = vmatprep.mubr.bf16.mxu0 %v1275_v49 }
  0x2e   :  { %728 = vmatprep.mubr.bf16.mxu1 %v1277_v50  ;;  %1207 = vmatpush3.bf16.msra.mxu1 %v1285_v57 }
  0x2f   :  { %1208 = vmatprep.subr.bf16.mxu1 %v1292_v2 }
  0x30   :  { %1159 = vmatpush3.bf16.msra.mxu0 %v1274_v48 }
  0x31   :  { %1160 = vmatprep.subr.bf16.mxu0 %v1281_v53 }
  0x32   :  { %1209 = vmatpush3.bf16.msra.mxu1 %v1292_v2 }
  0x33   :  { %665 = vmatmul.mubr.bf16.gmra.mrb[8].mxu0 %v1279_v51  ;;  %1210 = vmatprep.subr.bf16.mxu1 %v1295_v5 }
  0x34   :  { %729 = vmatmul.mubr.bf16.gmra.mrb[8].mxu1 %v1280_v52  ;;  %1161 = vmatpush3.bf16.msra.mxu0 %v1283_v55 }
  0x35   :  { %1162 = vmatprep.subr.bf16.mxu0 %v1284_v56  ;;  %672 = vmatprep.mubr.bf16.mxu0 %v977_v61 }
  0x36   :  { %736 = vmatprep.mubr.bf16.mxu1 %v979_v62  ;;  %1211 = vmatpush3.bf16.msra.mxu1 %v1295_v5 }
  0x37   :  { %1212 = vmatprep.subr.bf16.mxu1 %v1300_v8 }
  0x38   :  { %1163 = vmatpush3.bf16.msra.mxu0 %v1286_v58 }
  0x39   :  { %1164 = vmatprep.subr.bf16.mxu0 %v1291_v0 }
  0x3a   :  { %1213 = vmatpush3.bf16.msra.mxu1 %v1300_v8 }
  0x3b   :  { %673 = vmatmul.mubr.bf16.gmra.mrb[12].mxu0 %v976_v63 }
  0x3c   :  { %737 = vmatmul.mubr.bf16.gmra.mrb[12].mxu1 %v978_v1  ;;  %1165 = vmatpush3.bf16.msra.mxu0 %v1293_v3 }
  0x3d   :  { %1166 = vmatprep.subr.bf16.mxu0 %v1294_v4  ;;  %776 = vmatprep.mubr.bf16.mxu0 %v1299_v7 }
  0x3e   :  { %1214 = vmatprep.mubr.msk.bf16.mxu1 %vm603_vm0, %v1301_v9 }
  0x40   :  { %1167 = vmatpush3.bf16.msra.mxu0 %v1296_v6 }
  0x43   :  { %777 = vmatmul.mubr.bf16.vlgmr.msra.gmra.mrb[16].mxu0 %v1297_v10 }
  0x44   :  { %784 = vmatprep.mubr.bf16.mxu0 %v1303_v11  ;;  %1215 = vmatmul.mubr.msk.bf16.vlgmr.msra.gmra.mrb[16].mxu1 %vm603_vm0, %v1302_v12 }
  0x45   :  { %1218 = vmatprep.mubr.msk.bf16.mxu1 %vm603_vm0, %v1309_v13 }
  0x4b   :  { %785 = vmatmul.mubr.bf16.gmra.mrb[20].mxu0 %v1305_v14 }
  0x4c   :  { %792 = vmatprep.mubr.bf16.mxu0 %v1306_v15  ;;  %1219 = vmatmul.mubr.msk.bf16.gmra.mrb[20].mxu1 %vm603_vm0, %v1310_v16 }
  0x53   :  { %793 = vmatmul.mubr.bf16.gmra.mrb[24].mxu0 %v1308_v18 }
  0x54   :  { %800 = vmatprep.mubr.bf16.mxu0 %v981_v19 }
  0x5b   :  { %801 = vmatmul.mubr.bf16.gmra.mrb[28].mxu0 %v980_v20 }
  0xf6   :  { %v1088_v21 = vpop.f32.mrb[0].mxu0 }
  0xf7   :  { %v1128_v22 = vpop.f32.mrb[0].mxu1  ;;  %v1089_v23 = vpop.f32.mrb[1].mxu0 }
  0xf8   :  { %v1090_v24 = vadd.f32 %v1089_v23, %v1088_v21  ;;  %v1129_v25 = vpop.f32.mrb[1].mxu1  ;;  %v1091_v26 = vpop.f32.mrb[2].mxu0 }
  0xf9   :  { %v1130_v27 = vadd.f32 %v1129_v25, %v1128_v22  ;;  %v1131_v28 = vpop.f32.mrb[2].mxu1  ;;  %v1092_v29 = vpop.f32.mrb[3].mxu0 }
  0xfa   :  { %v1093_v30 = vadd.f32 %v1092_v29, %v1091_v26  ;;  %v1132_v31 = vpop.f32.mrb[3].mxu1 }
  0xfb   :  { %v715_v32 = vadd.f32 %v1130_v27, %v1090_v24  ;;  %v1133_v33 = vadd.f32 %v1132_v31, %v1131_v28 }
  0xfd   :  { %v718_v34 = vadd.f32 %v1133_v33, %v1093_v30 }
  0xfe   :  { %v1094_v35 = vpop.f32.mrb[4].mxu0 }
  0xff   :  { %v1134_v36 = vpop.f32.mrb[4].mxu1  ;;  %v1095_v37 = vpop.f32.mrb[5].mxu0 }
 0x100   :  { %v1096_v38 = vadd.f32 %v1095_v37, %v1094_v35  ;;  %v1135_v39 = vpop.f32.mrb[5].mxu1  ;;  %v1097_v40 = vpop.f32.mrb[6].mxu0 }
 0x101   :  { %v1136_v41 = vadd.f32 %v1135_v39, %v1134_v36  ;;  %v1137_v42 = vpop.f32.mrb[6].mxu1  ;;  %v1098_v43 = vpop.f32.mrb[7].mxu0 }
 0x102   :  { %v1099_v44 = vadd.f32 %v1098_v43, %v1097_v40  ;;  %v1138_v45 = vpop.f32.mrb[7].mxu1 }
 0x103   :  { %v723_v46 = vadd.f32 %v1136_v41, %v1096_v38  ;;  %v1139_v47 = vadd.f32 %v1138_v45, %v1137_v42 }
 0x105   :  { %v726_v48 = vadd.f32 %v1139_v47, %v1099_v44 }
 0x106   :  { %v1100_v49 = vpop.f32.mrb[8].mxu0 }
 0x107   :  { %v1140_v50 = vpop.f32.mrb[8].mxu1  ;;  %v1101_v51 = vpop.f32.mrb[9].mxu0 }
 0x108   :  { %v1102_v52 = vadd.f32 %v1101_v51, %v1100_v49  ;;  %v1141_v53 = vpop.f32.mrb[9].mxu1  ;;  %v1103_v54 = vpop.f32.mrb[10].mxu0 }
 0x109   :  { %v1142_v55 = vadd.f32 %v1141_v53, %v1140_v50  ;;  %v1143_v56 = vpop.f32.mrb[10].mxu1  ;;  %v1104_v57 = vpop.f32.mrb[11].mxu0 }
 0x10a   :  { %v1105_v58 = vadd.f32 %v1104_v57, %v1103_v54  ;;  %v1144_v59 = vpop.f32.mrb[11].mxu1 }
 0x10b   :  { %v731_v60 = vadd.f32 %v1142_v55, %v1102_v52  ;;  %v1145_v61 = vadd.f32 %v1144_v59, %v1143_v56 }
 0x10d   :  { %v1574_v62 = vadd.f32 %v1145_v61, %v1105_v58 }
 0x10e   :  { %v1106_v63 = vpop.f32.mrb[12].mxu0 }
 0x10f   :  { %v1146_v0 = vpop.f32.mrb[12].mxu1  ;;  %v1107_v1 = vpop.f32.mrb[13].mxu0 }
 0x110   :  { %v1108_v2 = vadd.f32 %v1107_v1, %v1106_v63  ;;  %v1147_v3 = vpop.f32.mrb[13].mxu1  ;;  %v1109_v4 = vpop.f32.mrb[14].mxu0 }
 0x111   :  { %v1148_v5 = vadd.f32 %v1147_v3, %v1146_v0  ;;  %v1110_v6 = vpop.f32.mrb[15].mxu0  ;;  %v1149_v7 = vpop.f32.mrb[14].mxu1 }
 0x112   :  { %v1150_v8 = vpop.f32.mrb[15].mxu1 }
 0x113   :  { %v1576_v9 = vadd.f32 %v1148_v5, %v1108_v2 }
 0x116   :  { %v1168_v10 = vpop.f32.mrb[16].mxu0 }
 0x117   :  { %v1169_v11 = vpop.f32.mrb[17].mxu0  ;;  %v1216_v16 = vpop.f32.mrb[16].mxu1 }
 0x118   :  { %v1170_v12 = vadd.f32 %v1169_v11, %v1168_v10  ;;  %v1171_v13 = vpop.f32.mrb[18].mxu0  ;;  %v842_v18 = vpop.f32.mrb[17].mxu1 }
 0x119   :  { %v1172_v14 = vpop.f32.mrb[19].mxu0  ;;  %v1217_v20 = vpop.f32.mrb[18].mxu1 }
 0x11a   :  { %v1173_v15 = vadd.f32 %v1172_v14, %v1171_v13  ;;  %v779_v17 = vadd.f32 %v1170_v12, %v715_v32  ;;  %v845_v22 = vpop.f32.mrb[19].mxu1 }
 0x11c   :  { %v843_v19 = vadd.f32 %v842_v18, %v779_v17  ;;  %v782_v21 = vadd.f32 %v1173_v15, %v718_v34 }
 0x11e   :  { %v846_v23 = vadd.f32 %v845_v22, %v782_v21  ;;  %v1174_v24 = vpop.f32.mrb[20].mxu0  ;;  %v922_v25 = vmul.f32 %v843_v19, %v843_v19 }
 0x11f   :  { %v1175_v26 = vpop.f32.mrb[21].mxu0  ;;  %v1220_v37 = vpop.f32.mrb[20].mxu1 }
 0x120   :  { %v1058_v27 = vpack.c.bf16 %v846_v23, %v843_v19  ;;  %v908_v28 = vadd.f32 %v846_v23, %v843_v19  ;;  %v923_v29 = vmul.f32 %v846_v23, %v846_v23  ;;  %v1176_v30 = vadd.f32 %v1175_v26, %v1174_v24  ;;  %v1177_v31 = vpop.f32.mrb[22].mxu0  ;;  %v858_v34 = vpop.f32.mrb[21].mxu1 }
 0x121   :  { %v1178_v33 = vpop.f32.mrb[23].mxu0  ;;  %v1221_v40 = vpop.f32.mrb[22].mxu1 }
 0x122   :  { %1059 = vst [vmem:[%s1597_s2] sm:$0xff] %v1058_v27   ;;  %v929_v32 = vadd.f32 %v923_v29, %v922_v25  ;;  %v787_v35 = vadd.f32 %v1176_v30, %v723_v46  ;;  %v1179_v36 = vadd.f32 %v1178_v33, %v1177_v31  ;;  %v861_v41 = vpop.f32.mrb[23].mxu1 }
 0x124   :  { %v851_v38 = vadd.f32 %v1216_v16, %v787_v35  ;;  %v790_v39 = vadd.f32 %v1179_v36, %v726_v48 }
 0x126   :  { %v924_v42 = vmul.f32 %v851_v38, %v851_v38  ;;  %v854_v43 = vadd.f32 %v1217_v20, %v790_v39  ;;  %v1180_v44 = vpop.f32.mrb[24].mxu0  ;;  %v909_v45 = vadd.f32 %v908_v28, %v851_v38 }
 0x127   :  { %v1181_v47 = vpop.f32.mrb[25].mxu0 }
 0x128   :  { %v1063_v49 = vpack.c.bf16 %v854_v43, %v851_v38  ;;  %v925_v50 = vmul.f32 %v854_v43, %v854_v43  ;;  %v1182_v51 = vadd.f32 %v1181_v47, %v1180_v44  ;;  %v1183_v52 = vpop.f32.mrb[26].mxu0  ;;  %v910_v53 = vadd.f32 %v909_v45, %v854_v43 }
 0x129   :  { %v1184_v54 = vpop.f32.mrb[27].mxu0  ;;  %v930_v55 = vadd.f32 %v929_v32, %v924_v42 }
 0x12a   :  { %1070 = vst [vmem:[%s1597_s2 + $0x8] sm:$0xff] %v1063_v49   ;;  %v1185_v46 = vadd.f32 %v1184_v54, %v1183_v52  ;;  %v795_v48 = vadd.f32 %v1182_v51, %v731_v60 }
 0x12b   :  { %v931_v56 = vadd.f32 %v930_v55, %v925_v50 }
 0x12c   :  { %v859_v57 = vadd.f32 %v858_v34, %v795_v48  ;;  %v798_v58 = vadd.f32 %v1185_v46, %v1574_v62 }
 0x12e   :  { %v911_v59 = vadd.f32 %v910_v53, %v859_v57  ;;  %v926_v61 = vmul.f32 %v859_v57, %v859_v57  ;;  %v862_v63 = vadd.f32 %v861_v41, %v798_v58  ;;  %v1186_v0 = vpop.f32.mrb[28].mxu0 }
 0x12f   :  { %v1187_v1 = vpop.f32.mrb[29].mxu0 }
 0x130   :  { %v932_v2 = vadd.f32 %v931_v56, %v926_v61  ;;  %v1068_v3 = vpack.c.bf16 %v862_v63, %v859_v57  ;;  %v912_v4 = vadd.f32 %v911_v59, %v862_v63  ;;  %v927_v5 = vmul.f32 %v862_v63, %v862_v63  ;;  %v1189_v6 = vpop.f32.mrb[30].mxu0 }
 0x131   :  { %v1188_v7 = vadd.f32 %v1187_v1, %v1186_v0  ;;  %v1190_v8 = vpop.f32.mrb[31].mxu0 }
 0x132   :  { %1071 = vst [vmem:[%s1597_s2 + $0x10] sm:$0xff] %v1068_v3   ;;  %v933_v60 = vadd.f32 %v932_v2, %v927_v5 }
 0x133   :  { %v803_v10 = vadd.f32 %v1188_v7, %v1576_v9 }
 0x135   :  { %v867_v62 = vadd.f32 %v1220_v37, %v803_v10 }
 0x137   :  { %v1054_v11 = vpack.c.bf16 %v867_v62, %v867_v62  ;;  %v914_v12 = vsel %vm913_vm1, %v867_v62, 0.0  ;;  %v928_v13 = vmul.f32 %v867_v62, %v867_v62 }
 0x138   :  { %v915_v14 = vadd.f32 %v914_v12, %v912_v4 }
 0x139   :  { %907 = vst [vmem:[%s1597_s2 + $0x18] sm:$0x7] %v1054_v11  ;;  %v934_v15 = vsel %vm913_vm1, %v928_v13, 0.0 }
 0x13a   :  { %v916_v16 = vrot.slane %v915_v14, 4  ;;  %v935_v17 = vadd.f32 %v934_v15, %v933_v60 }
 0x13c   :  { %v917_v18 = vadd.f32 %v916_v16, %v915_v14  ;;  %v936_v19 = vrot.slane %v935_v17, 4 }
 0x13e   :  { %v918_v20 = vrot.slane %v917_v18, 2  ;;  %v937_v21 = vadd.f32 %v936_v19, %v935_v17 }
 0x140   :  { %v919_v22 = vadd.f32 %v918_v20, %v917_v18  ;;  %v938_v23 = vrot.slane %v937_v21, 2 }
 0x142   :  { %v920_v9 = vrot.slane %v919_v22, 1  ;;  %v939_v24 = vadd.f32 %v938_v23, %v937_v21 }
 0x144   :  { %v940_v25 = vrot.slane %v939_v24, 1  ;;  %v921_v26 = vadd.f32 %v920_v9, %v919_v22 }
 0x146   :  { %v941_v27 = vadd.f32 %v940_v25, %v939_v24 }
 0x148   :  { %v943_v28 = vsel %vm942_vm2, %v921_v26, %v941_v27 }
 0x149   :  { %v945_v29 = vsel %vm944_vm3, %v943_v28, 0.0 }
 0x14a   :  { %946 = vst [vmem:[%s1598_s3] sm:$0xff] %v945_v29 }

// kernel: mlpconv_forward.5
= control target key start
LH: loop header
LB: loop body
LE: loop exit
PB: predicated region body
PF: predicated region fallthrough
CT: control target
= control target key end

     0   :  { %vm242_vm0 = vcmask 1045504   ;;  %vm271_vm1 = vcmask 1040384   ;;  %vm273_vm2 = vcmask 1041408   ;;  %s486_s3 = inlined_call_operand.vmem [shape: bf16[128,128], index: 3, kind: input, shape index: {}]   ;;  %s487_s0 = inlined_call_operand.vmem [shape: bf16[54,128], index: 0, kind: input, shape index: {}]   ;;  %s488_s1 = inlined_call_operand.vmem [shape: f32[1,128], index: 1, kind: input, shape index: {}]   ;;  %s489_s2 = inlined_call_operand.vmem [shape: f32[1,128], index: 2, kind: input, shape index: {}]   ;;  %s490_s4 = inlined_call_operand.vmem [shape: bf16[54,128], index: 4, kind: output, shape index: {0}]   ;;  %s491_s5 = inlined_call_operand.vmem [shape: f32[8,128], index: 5, kind: output, shape index: {1}]  }
   0x1   :  { %v391_v0 = vld [vmem:[%s486_s3] sm:$0xff]   ;;  %v392_v1 = vld [vmem:[%s486_s3 + $0x8] sm:$0xff]   ;;  %v393_v2 = vld [vmem:[%s486_s3 + $0x10] sm:$0xff]  }
   0x2   :  { %351 = vmatprep.subr.bf16.mxu0 %v391_v0  ;;  %375 = vmatprep.subr.bf16.mxu1 %v391_v0  ;;  %v394_v3 = vld [vmem:[%s486_s3 + $0x18] sm:$0xff]   ;;  %v309_v4 = vld [vmem:[%s487_s0] sm:$0xff]   ;;  %v336_v8 = vld [vmem:[%s487_s0 + $0x10] sm:$0xff]  }
   0x3   :  { %352 = vmatpush3.bf16.msra.mxu0 %v391_v0  ;;  %383 = vmatpush3.bf16.msra.mxu1 %v391_v0  ;;  %v284_v5 = vld [vmem:[%s488_s1] ss:$0 sm:$0xff]  ;;  %v310_v6 = vunpack.c.l.bf16 %v309_v4  ;;  %v311_v7 = vunpack.c.h.bf16 %v309_v4  ;;  %v318_v10 = vunpack.c.l.bf16 %v336_v8  ;;  %v319_v11 = vunpack.c.h.bf16 %v336_v8  ;;  %v335_v14 = vld [vmem:[%s487_s0 + $0x8] sm:$0xff]   ;;  %v26_v15 = vld [vmem:[%s487_s0 + $0x18] sm:$0x7] }
   0x4   :  { %353 = vmatprep.subr.bf16.mxu0 %v392_v1  ;;  %376 = vmatprep.subr.bf16.mxu1 %v392_v1  ;;  %v285_v9 = vld [vmem:[%s489_s2] ss:$0 sm:$0xff]  ;;  %v314_v21 = vunpack.c.l.bf16 %v335_v14  ;;  %v315_v22 = vunpack.c.h.bf16 %v335_v14  ;;  %v33_v24 = vunpack.c.l.bf16 %v26_v15  ;;  %v396_v28 = vld [vmem:[%s486_s3 + $0x28] sm:$0xff]   ;;  %v397_v36 = vld [vmem:[%s486_s3 + $0x30] sm:$0xff]  }
   0x5   :  { %v41_v12 = vmul.f32 %v310_v6, %v284_v5  ;;  %v42_v13 = vmul.f32 %v311_v7, %v284_v5  ;;  %v395_v16 = vld [vmem:[%s486_s3 + $0x20] sm:$0xff]   ;;  %v45_v17 = vmul.f32 %v318_v10, %v284_v5  ;;  %v46_v20 = vmul.f32 %v319_v11, %v284_v5  ;;  %v398_v40 = vld [vmem:[%s486_s3 + $0x38] sm:$0xff]  }
   0x6   :  { %v43_v32 = vmul.f32 %v314_v21, %v284_v5  ;;  %v44_v33 = vmul.f32 %v315_v22, %v284_v5  ;;  %v47_v34 = vmul.f32 %v284_v5, %v33_v24 }
   0x7   :  { %354 = vmatpush3.bf16.msra.mxu0 %v392_v1  ;;  %384 = vmatpush3.bf16.msra.mxu1 %v392_v1  ;;  %v55_v18 = vadd.f32 %v285_v9, %v41_v12  ;;  %v56_v19 = vadd.f32 %v285_v9, %v42_v13  ;;  %v59_v23 = vadd.f32 %v285_v9, %v45_v17 }
   0x8   :  { %355 = vmatprep.subr.bf16.mxu0 %v393_v2  ;;  %377 = vmatprep.subr.bf16.mxu1 %v393_v2  ;;  %v60_v27 = vadd.f32 %v285_v9, %v46_v20  ;;  %v57_v37 = vadd.f32 %v285_v9, %v43_v32  ;;  %v58_v38 = vadd.f32 %v285_v9, %v44_v33 }
   0x9   :  { %v62_v25 = vmax.f32 %v55_v18, 0.0  ;;  %v63_v26 = vmax.f32 %v56_v19, 0.0  ;;  %v66_v29 = vmax.f32 %v59_v23, 0.0  ;;  %v61_v39 = vadd.f32 %v285_v9, %v47_v34 }
   0xa   :  { %v67_v31 = vmax.f32 %v60_v27, 0.0  ;;  %v64_v41 = vmax.f32 %v57_v37, 0.0  ;;  %v65_v42 = vmax.f32 %v58_v38, 0.0 }
   0xb   :  { %356 = vmatpush3.bf16.msra.mxu0 %v393_v2  ;;  %385 = vmatpush3.bf16.msra.mxu1 %v393_v2  ;;  %v69_v30 = vpack.c.bf16 %v63_v26, %v62_v25  ;;  %v68_v43 = vmax.f32 %v61_v39, 0.0 }
   0xc   :  { %357 = vmatprep.subr.bf16.mxu0 %v394_v3  ;;  %378 = vmatprep.subr.bf16.mxu1 %v394_v3  ;;  %v71_v35 = vpack.c.bf16 %v67_v31, %v66_v29  ;;  %v70_v44 = vpack.c.bf16 %v65_v42, %v64_v41 }
   0xd   :  { %367 = vmatprep.mubr.bf16.mxu0 %v69_v30  ;;  %v72_v45 = vpack.c.bf16 %v68_v43, %v68_v43 }
   0xe   :  { %371 = vmatprep.mubr.bf16.mxu1 %v71_v35 }
   0xf   :  { %358 = vmatpush3.bf16.msra.mxu0 %v394_v3  ;;  %386 = vmatpush3.bf16.msra.mxu1 %v394_v3 }
  0x10   :  { %359 = vmatprep.subr.bf16.mxu0 %v395_v16  ;;  %379 = vmatprep.subr.bf16.mxu1 %v395_v16 }
  0x13   :  { %360 = vmatpush3.bf16.msra.mxu0 %v395_v16  ;;  %387 = vmatpush3.bf16.msra.mxu1 %v395_v16 }
  0x14   :  { %361 = vmatprep.subr.bf16.mxu0 %v396_v28  ;;  %380 = vmatprep.subr.bf16.mxu1 %v396_v28 }
  0x17   :  { %362 = vmatpush3.bf16.msra.mxu0 %v396_v28  ;;  %388 = vmatpush3.bf16.msra.mxu1 %v396_v28 }
  0x18   :  { %363 = vmatprep.subr.bf16.mxu0 %v397_v36  ;;  %381 = vmatprep.subr.bf16.mxu1 %v397_v36 }
  0x1b   :  { %364 = vmatpush3.bf16.msra.mxu0 %v397_v36  ;;  %389 = vmatpush3.bf16.msra.mxu1 %v397_v36 }
  0x1c   :  { %365 = vmatprep.subr.bf16.mxu0 %v398_v40  ;;  %382 = vmatprep.subr.bf16.mxu1 %v398_v40 }
  0x1f   :  { %366 = vmatpush3.bf16.msra.mxu0 %v398_v40  ;;  %390 = vmatpush3.bf16.msra.mxu1 %v398_v40 }
  0x22   :  { %368 = vmatmul.mubr.bf16.vlgmr.msra.gmra.mrb[0].mxu0 %v70_v44  ;;  %372 = vmatmul.mubr.bf16.vlgmr.msra.gmra.mrb[0].mxu1 %v72_v45 }
  0xf5   :  { %v369_v46 = vpop.f32.mrb[0].mxu0  ;;  %v373_v47 = vpop.f32.mrb[0].mxu1 }
  0xf6   :  { %v171_v48 = vpop.f32.mrb[1].mxu0  ;;  %v307_v49 = vpack.c.bf16 %v373_v47, %v373_v47  ;;  %v187_v50 = vpop.f32.mrb[1].mxu1  ;;  %v253_v61 = vmul.f32 %v369_v46, %v369_v46  ;;  %v257_v6 = vmul.f32 %v373_v47, %v373_v47  ;;  %v243_v10 = vsel %vm242_vm0, %v373_v47, 0.0 }
  0xf7   :  { %v370_v51 = vpop.f32.mrb[2].mxu0  ;;  %v374_v52 = vpop.f32.mrb[2].mxu1  ;;  %v251_v53 = vmul.f32 %v171_v48, %v171_v48  ;;  %v255_v3 = vmul.f32 %v187_v50, %v187_v50 }
  0xf8   :  { %v328_v54 = vpack.c.bf16 %v370_v51, %v369_v46  ;;  %v174_v55 = vpop.f32.mrb[3].mxu0  ;;  %236 = vst [vmem:[%s490_s4 + $0x18] sm:$0x7] %v307_v49  ;;  %v190_v56 = vpop.f32.mrb[3].mxu1  ;;  %v254_v0 = vmul.f32 %v370_v51, %v370_v51  ;;  %v263_v13 = vsel %vm242_vm0, %v257_v6, 0.0 }
  0xf9   :  { %v323_v57 = vpack.c.bf16 %v174_v55, %v171_v48  ;;  %v237_v58 = vadd.f32 %v174_v55, %v171_v48  ;;  %v252_v59 = vmul.f32 %v174_v55, %v174_v55  ;;  %v333_v60 = vpack.c.bf16 %v190_v56, %v187_v50 }
  0xfa   :  { %337 = vst [vmem:[%s490_s4 + $0x8] sm:$0xff] %v328_v54   ;;  %v256_v9 = vmul.f32 %v190_v56, %v190_v56 }
  0xfb   :  { %324 = vst [vmem:[%s490_s4] sm:$0xff] %v323_v57   ;;  %v238_v62 = vadd.f32 %v369_v46, %v237_v58  ;;  %v258_v63 = vadd.f32 %v252_v59, %v251_v53  ;;  %338 = vst [vmem:[%s490_s4 + $0x10] sm:$0xff] %v333_v60  }
  0xfd   :  { %v259_v1 = vadd.f32 %v258_v63, %v253_v61  ;;  %v239_v2 = vadd.f32 %v370_v51, %v238_v62 }
  0xff   :  { %v240_v4 = vadd.f32 %v239_v2, %v187_v50  ;;  %v260_v5 = vadd.f32 %v259_v1, %v254_v0 }
 0x101   :  { %v261_v7 = vadd.f32 %v260_v5, %v255_v3  ;;  %v241_v8 = vadd.f32 %v240_v4, %v190_v56 }
 0x103   :  { %v244_v11 = vadd.f32 %v243_v10, %v241_v8  ;;  %v262_v12 = vadd.f32 %v261_v7, %v256_v9 }
 0x105   :  { %v245_v14 = vrot.slane %v244_v11, 4  ;;  %v264_v15 = vadd.f32 %v263_v13, %v262_v12 }
 0x107   :  { %v246_v16 = vadd.f32 %v245_v14, %v244_v11  ;;  %v265_v17 = vrot.slane %v264_v15, 4 }
 0x109   :  { %v247_v18 = vrot.slane %v246_v16, 2  ;;  %v266_v19 = vadd.f32 %v265_v17, %v264_v15 }
 0x10b   :  { %v248_v20 = vadd.f32 %v247_v18, %v246_v16  ;;  %v267_v21 = vrot.slane %v266_v19, 2 }
 0x10d   :  { %v249_v22 = vrot.slane %v248_v20, 1  ;;  %v268_v23 = vadd.f32 %v267_v21, %v266_v19 }
 0x10f   :  { %v269_v24 = vrot.slane %v268_v23, 1  ;;  %v250_v25 = vadd.f32 %v249_v22, %v248_v20 }
 0x111   :  { %v270_v26 = vadd.f32 %v269_v24, %v268_v23 }
 0x113   :  { %v272_v27 = vsel %vm271_vm1, %v250_v25, %v270_v26 }
 0x114   :  { %v274_v28 = vsel %vm273_vm2, %v272_v27, 0.0 }
 0x115   :  { %275 = vst [vmem:[%s491_s5] sm:$0xff] %v274_v28 }

// kernel: mlpconv_forward.7
= control target key start
LH: loop header
LB: loop body
LE: loop exit
PB: predicated region body
PF: predicated region fallthrough
CT: control target
= control target key end

     0   :  { %s200_s0 = inlined_call_operand.vmem [shape: bf16[54,128], index: 0, kind: input, shape index: {}]   ;;  %s201_s1 = inlined_call_operand.vmem [shape: f32[1,128], index: 1, kind: input, shape index: {}]   ;;  %s202_s2 = inlined_call_operand.vmem [shape: f32[1,128], index: 2, kind: input, shape index: {}]   ;;  %s203_s3 = inlined_call_operand.vmem [shape: bf16[54,128], index: 3, kind: output, shape index: {}]  }
   0x1   :  { %v120_v0 = vld [vmem:[%s200_s0] sm:$0xff]   ;;  %v146_v4 = vld [vmem:[%s200_s0 + $0x8] sm:$0xff]   ;;  %v147_v5 = vld [vmem:[%s200_s0 + $0x10] sm:$0xff]  }
   0x2   :  { %v103_v1 = vld [vmem:[%s201_s1] ss:$0 sm:$0xff]  ;;  %v121_v2 = vunpack.c.l.bf16 %v120_v0  ;;  %v122_v3 = vunpack.c.h.bf16 %v120_v0  ;;  %v20_v6 = vld [vmem:[%s200_s0 + $0x18] sm:$0x7]  ;;  %v125_v8 = vunpack.c.l.bf16 %v146_v4  ;;  %v126_v9 = vunpack.c.h.bf16 %v146_v4 }
   0x3   :  { %v104_v7 = vld [vmem:[%s202_s2] ss:$0 sm:$0xff]  ;;  %v129_v10 = vunpack.c.l.bf16 %v147_v5  ;;  %v130_v11 = vunpack.c.h.bf16 %v147_v5  ;;  %v27_v14 = vunpack.c.l.bf16 %v20_v6 }
   0x4   :  { %v35_v12 = vmul.f32 %v121_v2, %v103_v1  ;;  %v36_v13 = vmul.f32 %v122_v3, %v103_v1  ;;  %v37_v15 = vmul.f32 %v125_v8, %v103_v1  ;;  %v38_v16 = vmul.f32 %v126_v9, %v103_v1 }
   0x5   :  { %v39_v17 = vmul.f32 %v129_v10, %v103_v1  ;;  %v40_v18 = vmul.f32 %v130_v11, %v103_v1  ;;  %v41_v21 = vmul.f32 %v103_v1, %v27_v14 }
   0x6   :  { %v49_v19 = vadd.f32 %v104_v7, %v35_v12  ;;  %v50_v20 = vadd.f32 %v104_v7, %v36_v13  ;;  %v51_v22 = vadd.f32 %v104_v7, %v37_v15  ;;  %v52_v23 = vadd.f32 %v104_v7, %v38_v16 }
   0x7   :  { %v53_v24 = vadd.f32 %v104_v7, %v39_v17  ;;  %v54_v25 = vadd.f32 %v104_v7, %v40_v18  ;;  %v55_v28 = vadd.f32 %v104_v7, %v41_v21 }
   0x8   :  { %v56_v26 = vmax.f32 %v49_v19, 0.0  ;;  %v57_v27 = vmax.f32 %v50_v20, 0.0  ;;  %v58_v29 = vmax.f32 %v51_v22, 0.0  ;;  %v59_v30 = vmax.f32 %v52_v23, 0.0 }
   0x9   :  { %v60_v31 = vmax.f32 %v53_v24, 0.0  ;;  %v61_v32 = vmax.f32 %v54_v25, 0.0  ;;  %v62_v34 = vmax.f32 %v55_v28, 0.0 }
   0xa   :  { %v134_v33 = vpack.c.bf16 %v57_v27, %v56_v26  ;;  %v139_v35 = vpack.c.bf16 %v59_v30, %v58_v29 }
   0xb   :  { %v144_v36 = vpack.c.bf16 %v61_v32, %v60_v31  ;;  %v118_v37 = vpack.c.bf16 %v62_v34, %v62_v34 }
   0xc   :  { %135 = vst [vmem:[%s203_s3] sm:$0xff] %v134_v33   ;;  %148 = vst [vmem:[%s203_s3 + $0x8] sm:$0xff] %v139_v35  }
   0xd   :  { %149 = vst [vmem:[%s203_s3 + $0x10] sm:$0xff] %v144_v36   ;;  %98 = vst [vmem:[%s203_s3 + $0x18] sm:$0x7] %v118_v37 }

</bundles_post_ra>
